<compile_context>
chip_gen: v5e
topology: v5e:2x2
jax: 0.10.0
libtpu: 0.0.40
codegen_flags: <defaults>
</compile_context>

<pallas_src>
import functools

import jax
import jax.numpy as jnp
from jax import lax
from jax.experimental import pallas as pl
from jax.experimental.pallas import tpu as pltpu


def _round_up(n, m):
    return (n + m - 1) // m * m


def _classifier_kernel(x_ref, w1_ref, b1_ref, w2t_ref, b2_ref, out_ref, *,
                       num_classes):
    # fc1: cast x to bf16 in-kernel (HBM read stays in the caller's dtype);
    # bf16 x bf16 matmul with f32 accumulation on the MXU, bias + ReLU in f32.
    x = x_ref[...].astype(jnp.bfloat16)
    h = jnp.dot(x, w1_ref[...], preferred_element_type=jnp.float32)
    h = jnp.maximum(h + b1_ref[...], 0.0)                     # (TB, Hp) f32

    # fc2 in NT form: contract the hidden axis of w2t (Cs, Hp) with the hidden
    # axis of h (TB, Hp) -> logits already transposed as (Cs, TB).
    lt = lax.dot_general(
        w2t_ref[...], h.astype(jnp.bfloat16),
        dimension_numbers=(((1,), (1,)), ((), ())),
        preferred_element_type=jnp.float32)
    lt = lt + b2_ref[...]                                     # (Cs, 1) broadcast

    if num_classes == 2:
        # Analytic 2-class log_softmax:
        #   log p0 = -softplus(l1 - l0);  log p1 = (l1 - l0) - softplus(l1 - l0)
        d = lt[1:2, :] - lt[0:1, :]                           # (1, TB)
        sp = jnp.maximum(d, 0.0) + jnp.log(1.0 + jnp.exp(-jnp.abs(d)))
        out_ref[0:1, :] = (-sp).astype(out_ref.dtype)
        out_ref[1:2, :] = (d - sp).astype(out_ref.dtype)
    else:
        # General path: padded class rows carry a -1e30 bias, so they vanish
        # under the (sublane-axis) log_softmax.
        m = jnp.max(lt, axis=0, keepdims=True)
        s = lt - m
        lse = jnp.log(jnp.sum(jnp.exp(s), axis=0, keepdims=True))
        out_ref[...] = (s - lse)[:num_classes, :].astype(out_ref.dtype)


@functools.partial(jax.jit, static_argnames=("block_b",))
def classifier_forward(x, w1, b1, w2, b2, *, block_b=4096):
    """x: (B, input_dim); w1: (input_dim, hidden); b1: (hidden,);
       w2: (hidden, num_classes); b2: (num_classes,).
       Returns log-probabilities of shape (B, num_classes), float32."""
    B, D = x.shape
    H = w1.shape[1]
    C = w2.shape[1]

    Hp = _round_up(max(H, 128), 128)     # lane-aligned hidden width
    Cs = _round_up(max(C, 8), 8)         # sublane-aligned class count

    # --- batch tile --------------------------------------------------------
    if B <= 128:
        TB = 128
    else:
        # Aim for a grid of >= 2 steps (feeds both v7x TensorCores) while
        # amortizing per-step overhead with large tiles.
        TB = max(128, min(block_b, _round_up((B + 1) // 2, 128)))

    # Cap TB by a VMEM budget (double-buffered x/out + in-kernel temporaries).
    per_row = (2 * D * x.dtype.itemsize    # x, double-buffered
               + D * 2                     # bf16 copy of x
               + Hp * (4 + 2)              # h in f32 + bf16
               + Cs * 4                    # transposed logits
               + 2 * C * 4)                # out, double-buffered
    tb_cap = max(128, ((24 << 20) // per_row) // 128 * 128)
    TB = min(TB, tb_cap)

    weight_bytes = 2 * (D * Hp * 2 + Hp * 4 + Cs * Hp * 2 + Cs * 4)
    vmem_limit = int(min(max(int(1.5 * (TB * per_row + weight_bytes)),
                             8 << 20), 48 << 20))

    # --- pad / cast the (tiny) weights only --------------------------------
    w1p = jnp.zeros((D, Hp), jnp.bfloat16).at[:, :H].set(w1.astype(jnp.bfloat16))
    b1p = jnp.zeros((1, Hp), jnp.float32).at[0, :H].set(b1.astype(jnp.float32))
    # w2 transposed to (classes, hidden) so the kernel's NT matmul emits the
    # logits already in the compact (C, B) output orientation.
    w2tp = jnp.zeros((Cs, Hp), jnp.bfloat16).at[:C, :H].set(
        w2.T.astype(jnp.bfloat16))
    pad_bias = 0.0 if C == 2 else -1e30    # only the general path needs -inf
    b2p = jnp.full((Cs, 1), pad_bias, jnp.float32).at[:C, 0].set(
        b2.astype(jnp.float32))

    grid = (pl.cdiv(B, TB),)
    kernel = functools.partial(_classifier_kernel, num_classes=C)

    out_t = pl.pallas_call(
        kernel,
        out_shape=jax.ShapeDtypeStruct((C, B), jnp.float32),
        grid=grid,
        in_specs=[
            pl.BlockSpec((TB, D), lambda i: (i, 0)),     # x tile, pipelined
            pl.BlockSpec((D, Hp), lambda i: (0, 0)),     # w1: VMEM-resident
            pl.BlockSpec((1, Hp), lambda i: (0, 0)),     # b1
            pl.BlockSpec((Cs, Hp), lambda i: (0, 0)),    # w2^T
            pl.BlockSpec((Cs, 1), lambda i: (0, 0)),     # b2
        ],
        out_specs=pl.BlockSpec((C, TB), lambda i: (0, i)),
        compiler_params=pltpu.CompilerParams(
            dimension_semantics=("parallel",),           # megacore-shard batch
            vmem_limit_bytes=vmem_limit,
        ),
    )(x, w1p, b1p, w2tp, b2p)

    return out_t.T                                       # (B, C)


def init_params(key, input_dim, hidden_dim=200, num_classes=2):
    """Deterministic init mimicking nn.Linear's uniform(-1/sqrt(fan_in), ...).
       Weights stored already transposed to (in, out) for the kernel."""
    k1, k2, k3, k4 = jax.random.split(key, 4)
    lim1 = 1.0 / jnp.sqrt(jnp.float32(input_dim))
    lim2 = 1.0 / jnp.sqrt(jnp.float32(hidden_dim))
    w1 = jax.random.uniform(k1, (input_dim, hidden_dim), jnp.float32, -lim1, lim1)
    b1 = jax.random.uniform(k2, (hidden_dim,), jnp.float32, -lim1, lim1)
    w2 = jax.random.uniform(k3, (hidden_dim, num_classes), jnp.float32, -lim2, lim2)
    b2 = jax.random.uniform(k4, (num_classes,), jnp.float32, -lim2, lim2)
    return w1, b1, w2, b2


def _reference(x, w1, b1, w2, b2):
    """Reference matching the kernel's precision (bf16 multiplicands, f32 accum)."""
    xb = x.astype(jnp.bfloat16).astype(jnp.float32)
    w1b = w1.astype(jnp.bfloat16).astype(jnp.float32)
    w2b = w2.astype(jnp.bfloat16).astype(jnp.float32)
    h = jnp.maximum(xb @ w1b + b1, 0.0)
    logits = h.astype(jnp.bfloat16).astype(jnp.float32) @ w2b + b2
    return jax.nn.log_softmax(logits, axis=1)


if __name__ == "__main__":
    key = jax.random.PRNGKey(0)
    kx, kp = jax.random.split(key)

    batch, input_dim, hidden_dim, num_classes = 8, 32, 200, 2
    x = jax.random.normal(kx, (batch, input_dim), jnp.float32)
    w1, b1, w2, b2 = init_params(kp, input_dim, hidden_dim, num_classes)

    out = classifier_forward(x, w1, b1, w2, b2)
    out = jax.block_until_ready(out)

    ref = _reference(x, w1, b1, w2, b2)
    assert out.shape == (batch, num_classes)
    assert bool(jnp.all(jnp.isfinite(out))), "non-finite log-probs"
    assert jnp.allclose(out, ref, atol=5e-3, rtol=5e-3), "mismatch vs reference"

    print("KERNEL_OK")
</pallas_src>

<mosaic_0001>
module attributes {stable_mosaic.version = 11 : i64} {
  func.func @_classifier_kernel(%arg0: i32, %arg1: memref<128x32xf32, #tpu.memory_space<vmem>>, %arg2: memref<32x256xbf16, #tpu.memory_space<vmem>>, %arg3: memref<1x256xf32, #tpu.memory_space<vmem>>, %arg4: memref<8x256xbf16, #tpu.memory_space<vmem>>, %arg5: memref<8x1xf32, #tpu.memory_space<vmem>>, %arg6: memref<2x128xf32, #tpu.memory_space<vmem>>) attributes {dimension_semantics = [#tpu.dimension_semantics<parallel>], iteration_bounds = array<i64: 1>, scalar_prefetch = 0 : i64, scratch_operands = 0 : i64, tpu.core_type = #tpu.core_type<tc>, window_params = [{transform_indices = @transform_0, window_bounds = array<i64: 128, 32>}, {pipeline_mode = #tpu.pipeline_mode<synchronous>, transform_indices = @transform_1, window_bounds = array<i64: 32, 256>}, {pipeline_mode = #tpu.pipeline_mode<synchronous>, transform_indices = @transform_2, window_bounds = array<i64: 1, 256>}, {pipeline_mode = #tpu.pipeline_mode<synchronous>, transform_indices = @transform_3, window_bounds = array<i64: 8, 256>}, {pipeline_mode = #tpu.pipeline_mode<synchronous>, transform_indices = @transform_4, window_bounds = array<i64: 8, 1>}, {transform_indices = @transform_5, window_bounds = array<i64: 2, 128>}]} {
    %c0 = arith.constant 0 : index
    %c0_0 = arith.constant 0 : index
    %0 = vector.load %arg1[%c0, %c0_0] : memref<128x32xf32, #tpu.memory_space<vmem>>, vector<128x32xf32>
    %1 = arith.truncf %0 : vector<128x32xf32> to vector<128x32xbf16>
    %c0_1 = arith.constant 0 : index
    %c0_2 = arith.constant 0 : index
    %2 = vector.load %arg2[%c0_1, %c0_2] : memref<32x256xbf16, #tpu.memory_space<vmem>>, vector<32x256xbf16>
    %cst = arith.constant dense<0.000000e+00> : vector<128x256xf32>
    %3 = tpu.matmul %1, %2, %cst {dimension_numbers = #tpu.dot_dimension_numbers<[1], [0], [0], [1], [0, 0, 1, 1], [], []>} : vector<128x32xbf16>, vector<32x256xbf16>, vector<128x256xf32> -> vector<128x256xf32>
    %c0_3 = arith.constant 0 : index
    %c0_4 = arith.constant 0 : index
    %4 = vector.load %arg3[%c0_3, %c0_4] : memref<1x256xf32, #tpu.memory_space<vmem>>, vector<1x256xf32>
    %5 = vector.broadcast %4 : vector<1x256xf32> to vector<128x256xf32>
    %6 = arith.addf %3, %5 : vector<128x256xf32>
    %cst_5 = arith.constant 0.000000e+00 : f32
    %7 = vector.broadcast %cst_5 : f32 to vector<128x256xf32>
    %8 = arith.maximumf %6, %7 : vector<128x256xf32>
    %c0_6 = arith.constant 0 : index
    %c0_7 = arith.constant 0 : index
    %9 = vector.load %arg4[%c0_6, %c0_7] : memref<8x256xbf16, #tpu.memory_space<vmem>>, vector<8x256xbf16>
    %10 = arith.truncf %8 : vector<128x256xf32> to vector<128x256xbf16>
    %cst_8 = arith.constant dense<0.000000e+00> : vector<8x128xf32>
    %11 = tpu.matmul %9, %10, %cst_8 {dimension_numbers = #tpu.dot_dimension_numbers<[1], [1], [0], [0], [0, 0, 1, 0], [], []>} : vector<8x256xbf16>, vector<128x256xbf16>, vector<8x128xf32> -> vector<8x128xf32>
    %c0_9 = arith.constant 0 : index
    %c0_10 = arith.constant 0 : index
    %12 = vector.load %arg5[%c0_9, %c0_10] : memref<8x1xf32, #tpu.memory_space<vmem>>, vector<8x1xf32>
    %13 = vector.broadcast %12 : vector<8x1xf32> to vector<8x128xf32>
    %14 = arith.addf %11, %13 : vector<8x128xf32>
    %15 = vector.extract_strided_slice %14 {offsets = [1, 0], sizes = [1, 128], strides = [1, 1]} : vector<8x128xf32> to vector<1x128xf32>
    %16 = vector.extract_strided_slice %14 {offsets = [0, 0], sizes = [1, 128], strides = [1, 1]} : vector<8x128xf32> to vector<1x128xf32>
    %17 = arith.subf %15, %16 : vector<1x128xf32>
    %cst_11 = arith.constant 0.000000e+00 : f32
    %18 = vector.broadcast %cst_11 : f32 to vector<1x128xf32>
    %19 = arith.maximumf %17, %18 : vector<1x128xf32>
    %20 = math.absf %17 : vector<1x128xf32>
    %cst_12 = arith.constant 0.000000e+00 : f32
    %21 = vector.broadcast %cst_12 : f32 to vector<1x128xf32>
    %22 = arith.subf %21, %20 : vector<1x128xf32>
    %23 = math.exp %22 : vector<1x128xf32>
    %cst_13 = arith.constant 1.000000e+00 : f32
    %24 = vector.broadcast %cst_13 : f32 to vector<1x128xf32>
    %25 = arith.addf %24, %23 : vector<1x128xf32>
    %26 = math.log %25 : vector<1x128xf32>
    %27 = arith.addf %19, %26 : vector<1x128xf32>
    %cst_14 = arith.constant 0.000000e+00 : f32
    %28 = vector.broadcast %cst_14 : f32 to vector<1x128xf32>
    %29 = arith.subf %28, %27 : vector<1x128xf32>
    %c0_15 = arith.constant 0 : index
    %c0_16 = arith.constant 0 : index
    %30 = vector.load %arg6[%c0_15, %c0_16] : memref<2x128xf32, #tpu.memory_space<vmem>>, vector<1x128xf32>
    tpu.vector_store %arg6[%c0_15, %c0_16], %29 {strides = array<i32>} : memref<2x128xf32, #tpu.memory_space<vmem>>, vector<1x128xf32>,
    %31 = arith.subf %17, %27 : vector<1x128xf32>
    %c1 = arith.constant 1 : index
    %c0_17 = arith.constant 0 : index
    %32 = vector.load %arg6[%c1, %c0_17] : memref<2x128xf32, #tpu.memory_space<vmem>>, vector<1x128xf32>
    tpu.vector_store %arg6[%c1, %c0_17], %31 {strides = array<i32>} : memref<2x128xf32, #tpu.memory_space<vmem>>, vector<1x128xf32>,
    return
  }
  func.func @transform_0(%arg0: i32) -> (i32, i32) {
    %c0_i32 = arith.constant 0 : i32
    %c0_i32_0 = arith.constant 0 : i32
    return %arg0, %c0_i32 : i32, i32
  }
  func.func @transform_1(%arg0: i32) -> (i32, i32) {
    %c0_i32 = arith.constant 0 : i32
    %c0_i32_0 = arith.constant 0 : i32
    %c0_i32_1 = arith.constant 0 : i32
    return %c0_i32, %c0_i32_0 : i32, i32
  }
  func.func @transform_2(%arg0: i32) -> (i32, i32) {
    %c0_i32 = arith.constant 0 : i32
    %c0_i32_0 = arith.constant 0 : i32
    %c0_i32_1 = arith.constant 0 : i32
    return %c0_i32, %c0_i32_0 : i32, i32
  }
  func.func @transform_3(%arg0: i32) -> (i32, i32) {
    %c0_i32 = arith.constant 0 : i32
    %c0_i32_0 = arith.constant 0 : i32
    %c0_i32_1 = arith.constant 0 : i32
    return %c0_i32, %c0_i32_0 : i32, i32
  }
  func.func @transform_4(%arg0: i32) -> (i32, i32) {
    %c0_i32 = arith.constant 0 : i32
    %c0_i32_0 = arith.constant 0 : i32
    %c0_i32_1 = arith.constant 0 : i32
    return %c0_i32, %c0_i32_0 : i32, i32
  }
  func.func @transform_5(%arg0: i32) -> (i32, i32) {
    %c0_i32 = arith.constant 0 : i32
    %c0_i32_0 = arith.constant 0 : i32
    return %c0_i32, %arg0 : i32, i32
  }
}

</mosaic_0001>

<bundles_post_ra>
// kernel: classifier_forward.1
= control target key start
LH: loop header
LB: loop body
LE: loop exit
PB: predicated region body
PF: predicated region fallthrough
CT: control target
= control target key end

     0   :  { %s581_s0 = inlined_call_operand.vmem [shape: f32[8,32], index: 0, kind: input, shape index: {}]   ;;  %s582_s1 = inlined_call_operand.vmem [shape: bf16[32,256], index: 1, kind: input, shape index: {}]   ;;  %s583_s2 = inlined_call_operand.vmem [shape: f32[1,256], index: 2, kind: input, shape index: {}]   ;;  %s584_s3 = inlined_call_operand.vmem [shape: bf16[8,256], index: 3, kind: input, shape index: {}]   ;;  %s585_s4 = inlined_call_operand.vmem [shape: f32[8,1], index: 4, kind: input, shape index: {}]   ;;  %s586_s5 = inlined_call_operand.hbm [shape: f32[2,8], index: 5, kind: output, shape index: {}]  }
   0x1   :  { %v330_v0 = vld [vmem:[%s582_s1 + $0x10] sm:$0xf]  ;;  %v355_v1 = vld [vmem:[%s582_s1 + $0x14] sm:$0xf0]  ;;  %v354_v2 = vld [vmem:[%s582_s1 + $0x14] sm:$0xf] }
   0x2   :  { %v331_v3 = vor.u32 %v355_v1, %v330_v0  ;;  %v332_v4 = vld [vmem:[%s582_s1 + $0x18] sm:$0xf0]  ;;  %v322_v5 = vld [vmem:[%s582_s1] sm:$0xf]  ;;  %v353_v6 = vld [vmem:[%s582_s1 + $0x4] sm:$0xf0] }
   0x3   :  { %v335_v7 = vor.u32 %v354_v2, %v332_v4  ;;  %v352_v8 = vld [vmem:[%s582_s1 + $0x4] sm:$0xf]  ;;  %v324_v9 = vld [vmem:[%s582_s1 + $0x8] sm:$0xf0]  ;;  %v323_v10 = vor.u32 %v353_v6, %v322_v5 }
   0x4   :  { %107 = vmatpush.bf16.msra.mxu0 %v331_v3  ;;  %v22_v11 = vld [vmem:[%s581_s0] sm:$0xff]  ;;  %v23_v12 = vld [vmem:[%s581_s0 + $0x8] sm:$0xff]  ;;  %v327_v13 = vor.u32 %v352_v8, %v324_v9 }
   0x5   :  { %156 = vmatpush.bf16.msra.mxu1 %v335_v7 }
   0x6   :  { %10 = vsyncpa [#allocation3], 0  ;;  %v38_v14 = vpack.c.bf16 %v23_v12, %v22_v11  ;;  %vm76_vm0 = vcmask 261120   ;;  %v24_v15 = vld [vmem:[%s581_s0 + $0x10] sm:$0xff]  ;;  %v25_v16 = vld [vmem:[%s581_s0 + $0x18] sm:$0xff]  ;;  %s311_s20 = sshll.u32 %s586_s5, 4  ;;  %s312_s20 = int_to_ptr.hbm [resolvable:$true] %s311_s20 }
   0x7   :  { %v39_v17 = vpack.c.bf16 %v25_v16, %v24_v15  ;;  %v26_v18 = vld [vmem:[%s581_s0 + $0x20] sm:$0xff]  ;;  %v27_v19 = vld [vmem:[%s581_s0 + $0x28] sm:$0xff]  ;;  %v28_v21 = vld [vmem:[%s581_s0 + $0x30] sm:$0xff] }
   0x8   :  { %108 = vmatpush.bf16.msra.mxu0 %v323_v10  ;;  %v40_v20 = vpack.c.bf16 %v27_v19, %v26_v18  ;;  %v29_v22 = vld [vmem:[%s581_s0 + $0x38] sm:$0xff]  ;;  %v30_v24 = vld [vmem:[%s581_s0 + $0x40] sm:$0xff]  ;;  %v31_v25 = vld [vmem:[%s581_s0 + $0x48] sm:$0xff] }
   0x9   :  { %157 = vmatpush.bf16.msra.mxu1 %v327_v13  ;;  %v41_v23 = vpack.c.bf16 %v29_v22, %v28_v21  ;;  %v42_v26 = vpack.c.bf16 %v31_v25, %v30_v24  ;;  %v32_v27 = vld [vmem:[%s581_s0 + $0x50] sm:$0xff]  ;;  %v33_v28 = vld [vmem:[%s581_s0 + $0x58] sm:$0xff]  ;;  %v34_v30 = vld [vmem:[%s581_s0 + $0x60] sm:$0xff] }
   0xa   :  { %v43_v29 = vpack.c.bf16 %v33_v28, %v32_v27  ;;  %v35_v31 = vld [vmem:[%s581_s0 + $0x68] sm:$0xff]  ;;  %v36_v33 = vld [vmem:[%s581_s0 + $0x70] sm:$0xff]  ;;  %v37_v34 = vld [vmem:[%s581_s0 + $0x78] sm:$0xff] }
   0xb   :  { %336 = vmatmul.msk.bf16.vlgmr.msra.gmra.mxu0 %vm76_vm0, %v38_v14  ;;  %v44_v32 = vpack.c.bf16 %v35_v31, %v34_v30  ;;  %v45_v35 = vpack.c.bf16 %v37_v34, %v36_v33  ;;  %v50_v36 = vld [vmem:[%s583_s2] sm:$0x3] }
   0xc   :  { %344 = vmatmul.msk.bf16.vlgmr.msra.gmra.mxu1 %vm76_vm0, %v38_v14  ;;  %v512_v39 = vperm.slane %v50_v36, 0  ;;  %v514_v40 = vperm.slane %v50_v36, 1 }
  0x1b   :  { %337 = vmatmul.msk.bf16.gmra.mxu0 %vm76_vm0, %v39_v17 }
  0x1c   :  { %345 = vmatmul.msk.bf16.gmra.mxu1 %vm76_vm0, %v39_v17 }
  0x2b   :  { %338 = vmatmul.msk.bf16.gmra.mxu0 %vm76_vm0, %v40_v20 }
  0x2c   :  { %346 = vmatmul.msk.bf16.gmra.mxu1 %vm76_vm0, %v40_v20 }
  0x3b   :  { %339 = vmatmul.msk.bf16.gmra.mxu0 %vm76_vm0, %v41_v23 }
  0x3c   :  { %347 = vmatmul.msk.bf16.gmra.mxu1 %vm76_vm0, %v41_v23 }
  0x4b   :  { %340 = vmatmul.msk.bf16.gmra.mxu0 %vm76_vm0, %v42_v26 }
  0x4c   :  { %348 = vmatmul.msk.bf16.gmra.mxu1 %vm76_vm0, %v42_v26 }
  0x5b   :  { %341 = vmatmul.msk.bf16.gmra.mxu0 %vm76_vm0, %v43_v29 }
  0x5c   :  { %349 = vmatmul.msk.bf16.gmra.mxu1 %vm76_vm0, %v43_v29 }
  0x6b   :  { %342 = vmatmul.msk.bf16.gmra.mxu0 %vm76_vm0, %v44_v32 }
  0x6c   :  { %350 = vmatmul.msk.bf16.gmra.mxu1 %vm76_vm0, %v44_v32 }
  0x7b   :  { %343 = vmatmul.msk.bf16.gmra.mxu0 %vm76_vm0, %v45_v35 }
  0x7c   :  { %351 = vmatmul.msk.bf16.gmra.mxu1 %vm76_vm0, %v45_v35 }
  0x88   :  { %v110_v37 = vpop.f32.mrf.mxu0 }
  0x89   :  { %v159_v38 = vpop.f32.mrf.mxu1  ;;  %v111_v41 = vadd.f32 %v110_v37, %v512_v39 }
  0x8a   :  { %v160_v42 = vadd.f32 %v159_v38, %v514_v40 }
  0x8b   :  { %v199_v47 = vmax.f32 %v111_v41, 0.0 }
  0x8c   :  { %v200_v49 = vmax.f32 %v160_v42, 0.0 }
  0x90   :  { %v112_v43 = vpop.f32.mrf.mxu0 }
  0x91   :  { %v113_v44 = vadd.f32 %v112_v43, %v512_v39  ;;  %v161_v45 = vpop.f32.mrf.mxu1 }
  0x92   :  { %v162_v46 = vadd.f32 %v161_v45, %v514_v40 }
  0x93   :  { %v201_v48 = vmax.f32 %v113_v44, 0.0 }
  0x94   :  { %v202_v50 = vmax.f32 %v162_v46, 0.0 }
  0x95   :  { %v520_v51 = vpack.c.bf16 %v201_v48, %v199_v47 }
  0x96   :  { %v522_v52 = vpack.c.bf16 %v202_v50, %v200_v49 }
  0x98   :  { %v115_v53 = vpop.f32.mrf.mxu0 }
  0x99   :  { %v164_v54 = vpop.f32.mrf.mxu1  ;;  %v116_v55 = vadd.f32 %v115_v53, %v512_v39 }
  0x9a   :  { %v165_v56 = vadd.f32 %v164_v54, %v514_v40 }
  0x9b   :  { %v203_v61 = vmax.f32 %v116_v55, 0.0 }
  0x9c   :  { %v204_v63 = vmax.f32 %v165_v56, 0.0 }
  0xa0   :  { %v117_v57 = vpop.f32.mrf.mxu0 }
  0xa1   :  { %v118_v58 = vadd.f32 %v117_v57, %v512_v39  ;;  %v166_v59 = vpop.f32.mrf.mxu1 }
  0xa2   :  { %v167_v60 = vadd.f32 %v166_v59, %v514_v40 }
  0xa3   :  { %v205_v62 = vmax.f32 %v118_v58, 0.0 }
  0xa4   :  { %v206_v0 = vmax.f32 %v167_v60, 0.0 }
  0xa5   :  { %v528_v1 = vpack.c.bf16 %v205_v62, %v203_v61 }
  0xa6   :  { %v530_v2 = vpack.c.bf16 %v206_v0, %v204_v63 }
  0xa8   :  { %v120_v3 = vpop.f32.mrf.mxu0 }
  0xa9   :  { %v169_v4 = vpop.f32.mrf.mxu1  ;;  %v121_v5 = vadd.f32 %v120_v3, %v512_v39 }
  0xaa   :  { %v170_v6 = vadd.f32 %v169_v4, %v514_v40 }
  0xab   :  { %v207_v11 = vmax.f32 %v121_v5, 0.0 }
  0xac   :  { %v208_v13 = vmax.f32 %v170_v6, 0.0 }
  0xb0   :  { %v122_v7 = vpop.f32.mrf.mxu0 }
  0xb1   :  { %v123_v8 = vadd.f32 %v122_v7, %v512_v39  ;;  %v171_v9 = vpop.f32.mrf.mxu1 }
  0xb2   :  { %v172_v10 = vadd.f32 %v171_v9, %v514_v40 }
  0xb3   :  { %v209_v12 = vmax.f32 %v123_v8, 0.0 }
  0xb4   :  { %v210_v14 = vmax.f32 %v172_v10, 0.0 }
  0xb5   :  { %v536_v15 = vpack.c.bf16 %v209_v12, %v207_v11 }
  0xb6   :  { %v538_v16 = vpack.c.bf16 %v210_v14, %v208_v13 }
  0xb8   :  { %v125_v17 = vpop.f32.mrf.mxu0 }
  0xb9   :  { %v174_v18 = vpop.f32.mrf.mxu1  ;;  %v126_v19 = vadd.f32 %v125_v17, %v512_v39 }
  0xba   :  { %v175_v20 = vadd.f32 %v174_v18, %v514_v40 }
  0xbb   :  { %v211_v25 = vmax.f32 %v126_v19, 0.0 }
  0xbc   :  { %v212_v27 = vmax.f32 %v175_v20, 0.0 }
  0xc0   :  { %v127_v21 = vpop.f32.mrf.mxu0 }
  0xc1   :  { %v128_v22 = vadd.f32 %v127_v21, %v512_v39  ;;  %v176_v23 = vpop.f32.mrf.mxu1 }
  0xc2   :  { %v177_v24 = vadd.f32 %v176_v23, %v514_v40 }
  0xc3   :  { %v213_v26 = vmax.f32 %v128_v22, 0.0 }
  0xc4   :  { %v214_v28 = vmax.f32 %v177_v24, 0.0 }
  0xc5   :  { %v544_v29 = vpack.c.bf16 %v213_v26, %v211_v25 }
  0xc6   :  { %v546_v30 = vpack.c.bf16 %v214_v28, %v212_v27 }
  0xc8   :  { %v130_v31 = vpop.f32.mrf.mxu0 }
  0xc9   :  { %v179_v32 = vpop.f32.mrf.mxu1  ;;  %v131_v33 = vadd.f32 %v130_v31, %v512_v39 }
  0xca   :  { %v180_v34 = vadd.f32 %v179_v32, %v514_v40 }
  0xcb   :  { %v215_v41 = vmax.f32 %v131_v33, 0.0 }
  0xcc   :  { %v216_v43 = vmax.f32 %v180_v34, 0.0 }
  0xd0   :  { %v132_v35 = vpop.f32.mrf.mxu0 }
  0xd1   :  { %v133_v36 = vadd.f32 %v132_v35, %v512_v39  ;;  %v181_v37 = vpop.f32.mrf.mxu1 }
  0xd2   :  { %v182_v38 = vadd.f32 %v181_v37, %v514_v40 }
  0xd3   :  { %v217_v42 = vmax.f32 %v133_v36, 0.0 }
  0xd4   :  { %v218_v44 = vmax.f32 %v182_v38, 0.0 }
  0xd5   :  { %v240_v45 = vpack.c.bf16 %v217_v42, %v215_v41 }
  0xd6   :  { %v241_v46 = vpack.c.bf16 %v218_v44, %v216_v43 }
  0xd8   :  { %v135_v47 = vpop.f32.mrf.mxu0 }
  0xd9   :  { %v184_v48 = vpop.f32.mrf.mxu1  ;;  %v136_v23 = vadd.f32 %v135_v47, %v512_v39 }
  0xda   :  { %v185_v24 = vadd.f32 %v184_v48, %v514_v40 }
  0xdb   :  { %v219_v27 = vmax.f32 %v136_v23, 0.0 }
  0xdc   :  { %v220_v28 = vmax.f32 %v185_v24, 0.0 }
  0xe0   :  { %v137_v49 = vpop.f32.mrf.mxu0 }
  0xe1   :  { %v186_v50 = vpop.f32.mrf.mxu1  ;;  %v138_v19 = vadd.f32 %v137_v49, %v512_v39 }
  0xe2   :  { %v187_v21 = vadd.f32 %v186_v50, %v514_v40 }
  0xe3   :  { %v221_v25 = vmax.f32 %v138_v19, 0.0 }
  0xe4   :  { %v222_v26 = vmax.f32 %v187_v21, 0.0 }
  0xe5   :  { %v242_v31 = vpack.c.bf16 %v221_v25, %v219_v27 }
  0xe6   :  { %v243_v32 = vpack.c.bf16 %v222_v26, %v220_v28 }
  0xe8   :  { %v140_v53 = vpop.f32.mrf.mxu0 }
  0xe9   :  { %v189_v54 = vpop.f32.mrf.mxu1  ;;  %v141_v11 = vadd.f32 %v140_v53, %v512_v39 }
  0xea   :  { %v190_v12 = vadd.f32 %v189_v54, %v514_v40 }
  0xeb   :  { %v223_v17 = vmax.f32 %v141_v11, 0.0 }
  0xec   :  { %v224_v18 = vmax.f32 %v190_v12, 0.0 }
  0xf0   :  { %v142_v55 = vpop.f32.mrf.mxu0 }
  0xf1   :  { %v191_v56 = vpop.f32.mrf.mxu1  ;;  %v143_v7 = vadd.f32 %v142_v55, %v512_v39 }
  0xf2   :  { %v192_v9 = vadd.f32 %v191_v56, %v514_v40 }
  0xf3   :  { %v225_v13 = vmax.f32 %v143_v7, 0.0 }
  0xf4   :  { %v226_v14 = vmax.f32 %v192_v9, 0.0 }
  0xf5   :  { %v244_v20 = vpack.c.bf16 %v225_v13, %v223_v17 }
  0xf6   :  { %v245_v22 = vpack.c.bf16 %v226_v14, %v224_v18 }
  0xf8   :  { %v145_v57 = vpop.f32.mrf.mxu0 }
  0xf9   :  { %v194_v58 = vpop.f32.mrf.mxu1  ;;  %v146_v59 = vadd.f32 %v145_v57, %v512_v39 }
  0xfa   :  { %v195_v60 = vadd.f32 %v194_v58, %v514_v40 }
  0xfb   :  { %v227_v3 = vmax.f32 %v146_v59, 0.0 }
  0xfc   :  { %v228_v5 = vmax.f32 %v195_v60, 0.0 }
 0x100   :  { %v147_v61 = vpop.f32.mrf.mxu0 }
 0x101   :  { %v148_v62 = vadd.f32 %v147_v61, %v512_v39  ;;  %v196_v63 = vpop.f32.mrf.mxu1  ;;  %v248_v39 = vld [vmem:[%s585_s4] sm:$0xff] }
 0x102   :  { %v197_v0 = vadd.f32 %v196_v63, %v514_v40  ;;  %v389_v40 = vmov 0  }
 0x103   :  { %v229_v4 = vmax.f32 %v148_v62, 0.0  ;;  %358 = vset.pattern.permute.xlu0 %v389_v40 }
 0x104   :  { %v230_v6 = vmax.f32 %v197_v0, 0.0  ;;  %251 = vperm.xlu0 %358, %v248_v39  }
 0x105   :  { %v246_v8 = vpack.c.bf16 %v229_v4, %v227_v3 }
 0x106   :  { %v247_v10 = vpack.c.bf16 %v230_v6, %v228_v5 }
 0x107   :  { %261 = vmatpush.bf16.xpose.msra.mxu2 %v246_v8 }
 0x108   :  { %274 = vmatpush.bf16.xpose.msra.mxu3 %v247_v10 }
 0x10f   :  { %262 = vmatpush.bf16.xpose.msra.mxu2 %v244_v20 }
 0x110   :  { %275 = vmatpush.bf16.xpose.msra.mxu3 %v245_v22 }
 0x117   :  { %263 = vmatpush.bf16.xpose.msra.mxu2 %v242_v31 }
 0x118   :  { %276 = vmatpush.bf16.xpose.msra.mxu3 %v243_v32 }
 0x11f   :  { %264 = vmatpush.bf16.xpose.msra.mxu2 %v240_v45 }
 0x120   :  { %277 = vmatpush.bf16.xpose.msra.mxu3 %v241_v46 }
 0x127   :  { %265 = vmatpush.bf16.xpose.msra.mxu2 %v544_v29  ;;  %v231_v29 = vld [vmem:[%s584_s3] sm:$0xff]  ;;  %s390_s3 = smov [#allocation2]  }
 0x128   :  { %278 = vmatpush.bf16.xpose.msra.mxu3 %v546_v30  ;;  %v255_v33 = vunpack.c.l.b16 %v231_v29  ;;  %v256_v34 = vunpack.c.h.b16 %v231_v29  ;;  %s309_s4 = sshll.u32 %s390_s3, 4  ;;  %s310_s4 = int_to_ptr.vmem [resolvable:$true] %s309_s4 }
 0x12a   :  { %v257_v30 = vpack.c.b16 %v255_v33, %v255_v33  ;;  %v258_v35 = vpack.c.b16 %v256_v34, %v256_v34 }
 0x12f   :  { %266 = vmatpush.bf16.xpose.msra.mxu2 %v536_v15 }
 0x130   :  { %279 = vmatpush.bf16.xpose.msra.mxu3 %v538_v16 }
 0x137   :  { %267 = vmatpush.bf16.xpose.msra.mxu2 %v528_v1 }
 0x138   :  { %280 = vmatpush.bf16.xpose.msra.mxu3 %v530_v2 }
 0x13f   :  { %268 = vmatpush.bf16.xpose.msra.mxu2 %v520_v51 }
 0x140   :  { %281 = vmatpush.bf16.xpose.msra.mxu3 %v522_v52 }
 0x146   :  { %269 = vmatmul.bf16.vlgmr.msra.gmra.mxu2 %v257_v30 }
 0x147   :  { %282 = vmatmul.bf16.vlgmr.msra.gmra.mxu3 %v258_v35 }
 0x176   :  { %v252_v15 = vpop.permute.xlu0 %251 }
 0x1c9   :  { %v270_v16 = vpop.f32.mrf.mxu2 }
 0x1ca   :  { %v271_v36 = vadd.f32 %v270_v16, %v252_v15  ;;  %v283_v1 = vpop.f32.mrf.mxu3 }
 0x1cc   :  { %v284_v37 = vadd.f32 %v283_v1, %v271_v36 }
 0x1ce   :  { %v288_v2 = vrot.slane %v284_v37, 7 }
 0x1d0   :  { %v290_v38 = vsub.f32 %v284_v37, %v288_v2 }
 0x1d1   :  { %v272_v41 = vpop.f32.mrf.mxu2 }
 0x1d2   :  { %v292_v42 = vand.u32 2147483647, %v290_v38  ;;  %v285_v43 = vpop.f32.mrf.mxu3  ;;  %v291_v47 = vmax.f32 %v290_v38, 0.0 }
 0x1d4   :  { %v293_v44 = vsub.f32 0.0, %v292_v42 }
 0x1d6   :  { %v294_v45 = vmul.f32 1.442695, %v293_v44 }
 0x1d8   :  { %359 = vpow2.f32 %v294_v45 }
 0x1de   :  { %v360_v51 = vpop.eup %359 }
 0x1df   :  { %v296_v46 = vadd.f32 1.0, %v360_v51 }
 0x1e1   :  { %361 = vlog2.f32 %v296_v46 }
 0x1e7   :  { %v362_v52 = vpop.eup %361 }
 0x1e8   :  { %v298_v48 = vmul.f32 0.6931472, %v362_v52 }
 0x1ea   :  { %v299_v49 = vadd.f32 %v298_v48, %v291_v47 }
 0x1ec   :  { %v300_v50 = vsub.f32 0.0, %v299_v49  ;;  %v302_v53 = vsub.f32 %v290_v38, %v299_v49 }
 0x1ee   :  { %301 = vst [vmem:[#allocation2 - $0x1] sm:$0x2] %v300_v50 }
 0x1ef   :  { %303 = vst [vmem:[#allocation2] sm:$0x2] %v302_v53 }
 0x1f0   :  { %314 = dma.vmem_to_hbm [thread:$0]  %s310_s4, 32, %s312_s20, [#allocation3]  }
 0x1f1   :  { %387 = dma.done.wait [#allocation3], 32  }
 0x1f2   :  { %388 = vsyncadd [#allocation3], 4294967264 }
 0x1f3   :  { %319 = vsyncpa [#allocation3], 1 }

</bundles_post_ra>
